<compile_context>
chip_gen: v6e
topology: v6e:2x2x1
jax: 0.10.0
libtpu: 0.0.40
codegen_flags: <defaults>
</compile_context>

<pallas_src>
import math

import jax
import jax.numpy as jnp
from jax.experimental import pallas as pl
from jax.experimental.pallas import tpu as pltpu


# ---------------------------------------------------------------------------
# Kernel
# ---------------------------------------------------------------------------
def _copy_kernel(x_ref, o_ref):
    o_ref[...] = x_ref[...]


_LANES = 128                         # lane-dense last dim (full unmasked vst)
_BLOCK_BYTES_CAP = 8 * 1024 * 1024   # ~8 MiB per block, dtype-independent
_SMALL_BYTES = 1 * 1024 * 1024       # <= 1 MiB -> single full-array block
_VMEM_LIMIT = 40 * 1024 * 1024       # 4 x 8 MiB double-buffered + headroom


def _round_up(n, m):
    return -(-n // m) * m


def _cdiv(a, b):
    return -(-a // b)


def _sublane_multiple(dtype):
    # Native packed sublane tile: 8 rows (32-bit), 16 (16-bit), 32 (8-bit).
    itemsize = jnp.dtype(dtype).itemsize
    return {4: 8, 2: 16, 1: 32}.get(itemsize, 8)


def _tiled_copy(x2d, bytes_accessed):
    """Pipelined copy of a lane-dense [rows, 128] slab."""
    rows, lanes = x2d.shape
    dtype = x2d.dtype
    itemsize = jnp.dtype(dtype).itemsize
    sub = _sublane_multiple(dtype)

    cap_rows = _BLOCK_BYTES_CAP // (lanes * itemsize)      # multiple of sub
    half_rows = _round_up(_cdiv(rows, 2), sub)             # keep >= 2 grid steps
    block_rows = max(sub, min(cap_rows, half_rows))
    grid = (_cdiv(rows, block_rows),)                      # partial last block OK

    return pl.pallas_call(
        _copy_kernel,
        out_shape=jax.ShapeDtypeStruct((rows, lanes), dtype),
        grid=grid,
        in_specs=[pl.BlockSpec((block_rows, lanes), lambda i: (i, 0))],
        out_specs=pl.BlockSpec((block_rows, lanes), lambda i: (i, 0)),
        cost_estimate=pl.CostEstimate(
            flops=0, transcendentals=0, bytes_accessed=bytes_accessed),
        compiler_params=pltpu.CompilerParams(
            dimension_semantics=("parallel",),
            vmem_limit_bytes=_VMEM_LIMIT),
    )(x2d)


@jax.jit
def _identity_forward(x):
    orig_shape = x.shape
    dtype = x.dtype
    total = int(math.prod(orig_shape)) if orig_shape else 1
    if total == 0 or x.ndim == 0:
        return x

    itemsize = jnp.dtype(dtype).itemsize
    total_bytes = total * itemsize

    # Small path: one full-array block in the original shape.  No reshape,
    # no pad, no slice; Mosaic handles arbitrary (ragged) last dims.
    if total_bytes <= _SMALL_BYTES:
        return pl.pallas_call(
            _copy_kernel,
            out_shape=jax.ShapeDtypeStruct(orig_shape, dtype),
        )(x)

    flat = x.reshape(-1)  # contiguous reshape: free under default layout

    if total % _LANES == 0:
        out2d = _tiled_copy(flat.reshape(total // _LANES, _LANES),
                            2 * total_bytes)
        return out2d.reshape(orig_shape)

    # TODO(synk): large non-128-divisible totals still pay one pad + one slice
    # round trip; a masked-store tail kernel (scalar-prefetched true length)
    # would remove both.  Pad is minimal (< 128 elements).
    padded = _round_up(total, _LANES)
    flat = jnp.pad(flat, (0, padded - total))
    out2d = _tiled_copy(flat.reshape(padded // _LANES, _LANES),
                        2 * padded * itemsize)
    return out2d.reshape(-1)[:total].reshape(orig_shape)


# ---------------------------------------------------------------------------
# Module mirror
# ---------------------------------------------------------------------------
class BaseModelPallas:
    """JAX/Pallas mirror of ocpmodels BaseModel."""

    def __init__(self, num_atoms=None, bond_feat_dim=None, num_targets=None):
        self.num_atoms = num_atoms
        self.bond_feat_dim = bond_feat_dim
        self.num_targets = num_targets
        # BaseModel registers no nn.Parameters.
        self._params = {}

    @property
    def num_params(self):
        # sum(p.numel() for p in self.parameters()) over an empty set -> 0
        return sum(int(jnp.size(p)) for p in self._params.values())

    def forward(self, data):
        # Abstract in PyTorch (raises NotImplementedError). Stand-in: identity
        # pass-through implemented as a tuned Pallas TPU copy kernel.
        return _identity_forward(data)


# ---------------------------------------------------------------------------
# Demo / self-check
# ---------------------------------------------------------------------------
if __name__ == "__main__":
    key = jax.random.PRNGKey(0)
    model = BaseModelPallas(num_atoms=10, bond_feat_dim=8, num_targets=1)

    # Small path: NCHW input [2, 4, 16, 16], single full-array block.
    x = jax.random.normal(key, (2, 4, 16, 16), dtype=jnp.float32)
    out = jax.block_until_ready(model.forward(x))
    assert out.shape == x.shape
    assert out.dtype == x.dtype
    assert bool(jnp.all(out == x))

    # Ragged bf16 input: still a single full-array block (no pad/slice).
    x2 = jax.random.normal(key, (3, 5, 7), dtype=jnp.bfloat16)
    out2 = jax.block_until_ready(model.forward(x2))
    assert out2.shape == x2.shape
    assert out2.dtype == x2.dtype
    assert bool(jnp.all(out2 == x2))

    # Tiled path: 2 MiB f32 slab -> lane-dense [4096, 128], grid of 2
    # parallel blocks, no padding.
    x3 = jax.random.normal(key, (1024, 512), dtype=jnp.float32)
    out3 = jax.block_until_ready(model.forward(x3))
    assert out3.shape == x3.shape
    assert out3.dtype == x3.dtype
    assert bool(jnp.all(out3 == x3))

    assert model.num_params == 0

    print("KERNEL_OK")
</pallas_src>

<mosaic_0001>
module attributes {stable_mosaic.version = 11 : i64} {
  func.func @_copy_kernel(%arg0: memref<2x4x16x16xf32, #tpu.memory_space<vmem>>, %arg1: memref<2x4x16x16xf32, #tpu.memory_space<vmem>>) attributes {dimension_semantics = [], scalar_prefetch = 0 : i64, scratch_operands = 0 : i64, tpu.core_type = #tpu.core_type<tc>} {
    %c0 = arith.constant 0 : index
    %c0_0 = arith.constant 0 : index
    %c0_1 = arith.constant 0 : index
    %c0_2 = arith.constant 0 : index
    %0 = vector.load %arg0[%c0, %c0_0, %c0_1, %c0_2] : memref<2x4x16x16xf32, #tpu.memory_space<vmem>>, vector<2x4x16x16xf32>
    %c0_3 = arith.constant 0 : index
    %c0_4 = arith.constant 0 : index
    %c0_5 = arith.constant 0 : index
    %c0_6 = arith.constant 0 : index
    %1 = vector.load %arg1[%c0_3, %c0_4, %c0_5, %c0_6] : memref<2x4x16x16xf32, #tpu.memory_space<vmem>>, vector<2x4x16x16xf32>
    tpu.vector_store %arg1[%c0_3, %c0_4, %c0_5, %c0_6], %0 {strides = array<i32>} : memref<2x4x16x16xf32, #tpu.memory_space<vmem>>, vector<2x4x16x16xf32>,
    return
  }
}

</mosaic_0001>

<bundles_post_ra>
// kernel: _identity_forward.1
= control target key start
LH: loop header
LB: loop body
LE: loop exit
PB: predicated region body
PF: predicated region fallthrough
CT: control target
= control target key end

     0   :  { %6 = vsyncpa [#allocation3], 0  ;;  %s163_s0 = inlined_call_operand.hbm [shape: f32[2,4,16,16], index: 0, kind: input, shape index: {}]   ;;  %s164_s1 = inlined_call_operand.hbm [shape: f32[2,4,16,16], index: 1, kind: output, shape index: {}]  }
   0x1   :  { %7 = vsyncpa [#allocation4], 0  ;;  %s121_s6 = smov [#allocation2]  }
   0x2   :  { %s13_s7 = sshll.u32 %s121_s6, 4  ;;  %s14_s7 = int_to_ptr.vmem [resolvable:$true] %s13_s7 }
   0x3   :  { %s85_s8 = scalar_lea.vmem %s14_s7, 2048  ;;  %p90_p1 = scmp.lt.s32.totalorder %s14_s7, %s14_s7 }
   0x4   :  { %p86_p0 = scmp.ne.s32.totalorder %s14_s7, %s85_s8  ;;  %p91_p2 = scmp.lt.s32.totalorder %s85_s8, %s85_s8 }
   0x6   :  { %p92_p3 = por %p91_p2, %p90_p1 }
   0x8   :  { %p93_p4 = pnand %p92_p3, %p86_p0 }
   0xa   :  { %96 = shalt.err (!%p93_p4)
}
   0xb   :  { %s122_s9 = smov 128   ;;  %s123_s10 = smov 8  }
   0xc   :  { %19 = dma.hbm_to_vmem [thread:$0]  %s163_s0, 2048, %s14_s7, [#allocation3], %s122_s9, %s122_s9, %s123_s10  }
   0xd   :  { %117 = dma.done.wait [#allocation3], 2048  }
   0xe   :  { %118 = vsyncadd [#allocation3], 4294965248  ;;  %vm39_vm0 = vcmask 130048   ;;  %v23_v0 = vld [vmem:[#allocation2] sm:$0xff]  ;;  %v24_v1 = vld [vmem:[#allocation2 + $0x8] sm:$0xff]  ;;  %s124_s13 = smov [#allocation5]  }
   0xf   :  { %v25_v2 = vld [vmem:[#allocation2 + $0x10] sm:$0xff]  ;;  %40 = vst.msk [vmem:[#allocation5] sm:$0xff] %vm39_vm0, %v23_v0  ;;  %41 = vst.msk [vmem:[#allocation5 + $0x8] sm:$0xff] %vm39_vm0, %v24_v1  ;;  %v26_v3 = vld [vmem:[#allocation2 + $0x18] sm:$0xff]  ;;  %s61_s14 = sshll.u32 %s124_s13, 4  ;;  %s62_s14 = int_to_ptr.vmem [resolvable:$true] %s61_s14 }
  0x10   :  { %42 = vst.msk [vmem:[#allocation5 + $0x10] sm:$0xff] %vm39_vm0, %v25_v2  ;;  %v27_v4 = vld [vmem:[#allocation2 + $0x20] sm:$0xff]  ;;  %v28_v5 = vld [vmem:[#allocation2 + $0x28] sm:$0xff]  ;;  %43 = vst.msk [vmem:[#allocation5 + $0x18] sm:$0xff] %vm39_vm0, %v26_v3  ;;  %s97_s0 = scalar_lea.vmem %s62_s14, 2048  ;;  %p102_p6 = scmp.lt.s32.totalorder %s62_s14, %s62_s14 }
  0x11   :  { %44 = vst.msk [vmem:[#allocation5 + $0x20] sm:$0xff] %vm39_vm0, %v27_v4  ;;  %45 = vst.msk [vmem:[#allocation5 + $0x28] sm:$0xff] %vm39_vm0, %v28_v5  ;;  %v29_v6 = vld [vmem:[#allocation2 + $0x30] sm:$0xff]  ;;  %v30_v7 = vld [vmem:[#allocation2 + $0x38] sm:$0xff]  ;;  %p98_p5 = scmp.ne.s32.totalorder %s62_s14, %s97_s0  ;;  %p103_p7 = scmp.lt.s32.totalorder %s97_s0, %s97_s0 }
  0x12   :  { %v31_v8 = vld [vmem:[#allocation2 + $0x40] sm:$0xff]  ;;  %46 = vst.msk [vmem:[#allocation5 + $0x30] sm:$0xff] %vm39_vm0, %v29_v6  ;;  %47 = vst.msk [vmem:[#allocation5 + $0x38] sm:$0xff] %vm39_vm0, %v30_v7  ;;  %v32_v9 = vld [vmem:[#allocation2 + $0x48] sm:$0xff] }
  0x13   :  { %48 = vst.msk [vmem:[#allocation5 + $0x40] sm:$0xff] %vm39_vm0, %v31_v8  ;;  %v33_v10 = vld [vmem:[#allocation2 + $0x50] sm:$0xff]  ;;  %v34_v11 = vld [vmem:[#allocation2 + $0x58] sm:$0xff]  ;;  %49 = vst.msk [vmem:[#allocation5 + $0x48] sm:$0xff] %vm39_vm0, %v32_v9  ;;  %p104_p8 = por %p103_p7, %p102_p6 }
  0x14   :  { %50 = vst.msk [vmem:[#allocation5 + $0x50] sm:$0xff] %vm39_vm0, %v33_v10  ;;  %51 = vst.msk [vmem:[#allocation5 + $0x58] sm:$0xff] %vm39_vm0, %v34_v11  ;;  %v35_v12 = vld [vmem:[#allocation2 + $0x60] sm:$0xff]  ;;  %v36_v13 = vld [vmem:[#allocation2 + $0x68] sm:$0xff] }
  0x15   :  { %v37_v14 = vld [vmem:[#allocation2 + $0x70] sm:$0xff]  ;;  %52 = vst.msk [vmem:[#allocation5 + $0x60] sm:$0xff] %vm39_vm0, %v35_v12  ;;  %53 = vst.msk [vmem:[#allocation5 + $0x68] sm:$0xff] %vm39_vm0, %v36_v13  ;;  %v38_v15 = vld [vmem:[#allocation2 + $0x78] sm:$0xff]  ;;  %p105_p9 = pnand %p104_p8, %p98_p5 }
  0x16   :  { %54 = vst.msk [vmem:[#allocation5 + $0x70] sm:$0xff] %vm39_vm0, %v37_v14  ;;  %55 = vst.msk [vmem:[#allocation5 + $0x78] sm:$0xff] %vm39_vm0, %v38_v15 }
  0x17   :  { %108 = shalt.err (!%p105_p9)
}
  0x18   :  { %67 = dma.vmem_to_hbm [thread:$0]  %s62_s14, 2048, %s164_s1, [#allocation4], %s122_s9, %s122_s9, %s123_s10  }
  0x19   :  { %119 = dma.done.wait [#allocation4], 2048  }
  0x1a   :  { %120 = vsyncadd [#allocation4], 4294965248 }
  0x1b   :  { %71 = vsyncpa [#allocation3], 1 }
  0x1c   :  { %72 = vsyncpa [#allocation4], 1 }

</bundles_post_ra>
